<compile_context>
chip_gen: v6e
topology: v6e:2x2x1
jax: 0.10.0
libtpu: 0.0.40
codegen_flags: <defaults>
</compile_context>

<pallas_src>
import jax
import jax.numpy as jnp
from jax.experimental import pallas as pl
from jax.experimental.pallas import tpu as pltpu


def _csse_kernel(x_ref, w1t_ref, b1_ref, w2t_ref, b2_ref, wc_ref, bc_ref, o_ref):
    # x_ref block: (TB, C, W) float32
    x = x_ref[...]

    # ---------------- cSE branch ----------------
    # Squeeze: mean over spatial axis -> (TB, C)   (single cross-lane reduce).
    squeeze = jnp.mean(x, axis=2)                                   # (TB, C)

    # fc1 + ReLU : (TB, C) @ (C, Cr) + (1, Cr) -> (TB, Cr)
    h = jnp.dot(squeeze, w1t_ref[...], preferred_element_type=jnp.float32)
    h = jnp.maximum(h + b1_ref[...], 0.0)

    # fc2 + sigmoid : (TB, Cr) @ (Cr, C) + (1, C) -> (TB, C)
    g = jnp.dot(h, w2t_ref[...], preferred_element_type=jnp.float32)
    g = jax.nn.sigmoid(g + b2_ref[...])                             # (TB, C)

    cse = x * g[:, :, None]                                         # (TB, C, W)

    # ---------------- sSE branch ----------------
    # 1x1 conv over channels == weighted sum over C, done on the VPU:
    # broadcast multiply by wc (C,1) then sublane-reduce over the channel axis.
    wc = wc_ref[...]                                                # (C, 1)
    s = jnp.sum(x * wc[None, :, :], axis=1, keepdims=True)          # (TB, 1, W)
    s = jax.nn.sigmoid(s + bc_ref[0])                               # scalar bias (SMEM)

    sse = x * s                                                     # (TB, C, W)

    # ---------------- combine ----------------
    o_ref[...] = jnp.maximum(cse, sse).astype(o_ref.dtype)


def _pick_batch_tile(B, C, W, target_bytes=4 << 20):
    """Largest divisor of B whose (TB, C, W) f32 slab stays under ~target_bytes.

    Double-buffered input + output is ~4x the slab, so 4 MiB keeps the kernel
    well under the 32 MiB scoped-VMEM default (and v7x's 64 MiB physical).
    """
    slab = C * W * 4
    best = 1
    for tb in range(1, B + 1):
        if B % tb == 0 and tb * slab <= target_bytes:
            best = tb
    return best


def channel_spatial_se_1d(x, w1, b1, w2, b2, wc, bc):
    """x: (B, C, W) float32.  Returns (B, C, W)."""
    B, C, W = x.shape
    Cr = w1.shape[0]
    TB = _pick_batch_tile(B, C, W)

    # Pre-transpose / reshape parameters in the wrapper so the kernel body has
    # zero XLU transposes and broadcasts line up without layout round-trips.
    w1t = w1.T                      # (C, Cr)
    w2t = w2.T                      # (Cr, C)
    b1_2d = b1.reshape(1, Cr)       # (1, Cr)
    b2_2d = b2.reshape(1, C)        # (1, C)
    wc_col = wc.reshape(C, 1)       # (C, 1)
    bc_1d = bc.reshape(1)           # (1,)  -> SMEM scalar

    full = lambda shape: pl.BlockSpec(shape, lambda b: tuple(0 for _ in shape))

    return pl.pallas_call(
        _csse_kernel,
        out_shape=jax.ShapeDtypeStruct((B, C, W), x.dtype),
        grid_spec=pltpu.PrefetchScalarGridSpec(
            num_scalar_prefetch=0,
            grid=(B // TB,),
            in_specs=[
                pl.BlockSpec((TB, C, W), lambda b: (b, 0, 0)),         # x (TB rows / step)
                full((C, Cr)),                                          # fc1 weight^T
                full((1, Cr)),                                          # fc1 bias
                full((Cr, C)),                                          # fc2 weight^T
                full((1, C)),                                           # fc2 bias
                full((C, 1)),                                           # conv weight (column)
                pl.BlockSpec(memory_space=pltpu.MemorySpace.SMEM),      # conv bias (scalar)
            ],
            out_specs=pl.BlockSpec((TB, C, W), lambda b: (b, 0, 0)),
        ),
        compiler_params=pltpu.CompilerParams(
            dimension_semantics=("parallel",),   # megacore sharding on v7x
        ),
    )(x, w1t, b1_2d, w2t, b2_2d, wc_col, bc_1d)


def _reference(x, w1, b1, w2, b2, wc, bc):
    """Pure-JAX reference mirroring the PyTorch forward."""
    squeeze = jnp.mean(x, axis=2)                                  # (B, C)
    h = jax.nn.relu(squeeze @ w1.T + b1)                           # (B, Cr)
    g = jax.nn.sigmoid(h @ w2.T + b2)                              # (B, C)
    cse = x * g[:, :, None]
    s = jax.nn.sigmoid(jnp.einsum('bcw,c->bw', x, wc) + bc[0])     # (B, W)
    sse = x * s[:, None, :]
    return jnp.maximum(cse, sse)


if __name__ == "__main__":
    B, C, W = 2, 4, 16
    reduction_ratio = 2
    Cr = C // reduction_ratio

    key = jax.random.PRNGKey(0)
    kx, k1, k2, k3, k4, k5, k6 = jax.random.split(key, 7)

    x = jax.random.normal(kx, (B, C, W), dtype=jnp.float32)

    # Deterministic parameter init (shapes match nn.Linear / nn.Conv1d).
    w1 = jax.random.normal(k1, (Cr, C), dtype=jnp.float32) * 0.5   # fc1.weight
    b1 = jax.random.normal(k2, (Cr,), dtype=jnp.float32) * 0.1     # fc1.bias
    w2 = jax.random.normal(k3, (C, Cr), dtype=jnp.float32) * 0.5   # fc2.weight
    b2 = jax.random.normal(k4, (C,), dtype=jnp.float32) * 0.1      # fc2.bias
    wc = jax.random.normal(k5, (C,), dtype=jnp.float32) * 0.5      # conv.weight (1,C,1) flat
    bc = jax.random.normal(k6, (1,), dtype=jnp.float32) * 0.1      # conv.bias

    out = channel_spatial_se_1d(x, w1, b1, w2, b2, wc, bc)
    out = jax.block_until_ready(out)

    ref = _reference(x, w1, b1, w2, b2, wc, bc)
    assert out.shape == (B, C, W)
    assert jnp.allclose(out, ref, atol=1e-5, rtol=1e-5), "mismatch vs reference"

    print("KERNEL_OK")
</pallas_src>

<mosaic_0001>
module attributes {stable_mosaic.version = 11 : i64} {
  func.func @_csse_kernel(%arg0: i32, %arg1: memref<2x4x16xf32, #tpu.memory_space<vmem>>, %arg2: memref<4x2xf32, #tpu.memory_space<vmem>>, %arg3: memref<1x2xf32, #tpu.memory_space<vmem>>, %arg4: memref<2x4xf32, #tpu.memory_space<vmem>>, %arg5: memref<1x4xf32, #tpu.memory_space<vmem>>, %arg6: memref<4x1xf32, #tpu.memory_space<vmem>>, %arg7: memref<1xf32, #tpu.memory_space<smem>>, %arg8: memref<2x4x16xf32, #tpu.memory_space<vmem>>) attributes {dimension_semantics = [#tpu.dimension_semantics<parallel>], iteration_bounds = array<i64: 1>, scalar_prefetch = 0 : i64, scratch_operands = 0 : i64, tpu.core_type = #tpu.core_type<tc>, window_params = [{transform_indices = @transform_0, window_bounds = array<i64: 2, 4, 16>}, {pipeline_mode = #tpu.pipeline_mode<synchronous>, transform_indices = @transform_1, window_bounds = array<i64: 4, 2>}, {pipeline_mode = #tpu.pipeline_mode<synchronous>, transform_indices = @transform_2, window_bounds = array<i64: 1, 2>}, {pipeline_mode = #tpu.pipeline_mode<synchronous>, transform_indices = @transform_3, window_bounds = array<i64: 2, 4>}, {pipeline_mode = #tpu.pipeline_mode<synchronous>, transform_indices = @transform_4, window_bounds = array<i64: 1, 4>}, {pipeline_mode = #tpu.pipeline_mode<synchronous>, transform_indices = @transform_5, window_bounds = array<i64: 4, 1>}, {transform_indices = @transform_6, window_bounds = array<i64: 1>}, {transform_indices = @transform_7, window_bounds = array<i64: 2, 4, 16>}]} {
    %c0 = arith.constant 0 : index
    %c0_0 = arith.constant 0 : index
    %c0_1 = arith.constant 0 : index
    %0 = vector.load %arg1[%c0, %c0_0, %c0_1] : memref<2x4x16xf32, #tpu.memory_space<vmem>>, vector<2x4x16xf32>
    %cst = arith.constant dense<0.000000e+00> : vector<2x4xf32>
    %1 = vector.multi_reduction <add>, %0, %cst [2] : vector<2x4x16xf32> to vector<2x4xf32>
    %cst_2 = arith.constant 1.600000e+01 : f32
    %2 = vector.broadcast %cst_2 : f32 to vector<2x4xf32>
    %3 = arith.divf %1, %2 : vector<2x4xf32>
    %c0_3 = arith.constant 0 : index
    %c0_4 = arith.constant 0 : index
    %4 = vector.load %arg2[%c0_3, %c0_4] : memref<4x2xf32, #tpu.memory_space<vmem>>, vector<4x2xf32>
    %cst_5 = arith.constant dense<0.000000e+00> : vector<2x2xf32>
    %5 = tpu.matmul %3, %4, %cst_5 {dimension_numbers = #tpu.dot_dimension_numbers<[1], [0], [0], [1], [0, 0, 1, 1], [], []>} : vector<2x4xf32>, vector<4x2xf32>, vector<2x2xf32> -> vector<2x2xf32>
    %c0_6 = arith.constant 0 : index
    %c0_7 = arith.constant 0 : index
    %6 = vector.load %arg3[%c0_6, %c0_7] : memref<1x2xf32, #tpu.memory_space<vmem>>, vector<1x2xf32>
    %7 = vector.broadcast %6 : vector<1x2xf32> to vector<2x2xf32>
    %8 = arith.addf %5, %7 : vector<2x2xf32>
    %cst_8 = arith.constant 0.000000e+00 : f32
    %9 = vector.broadcast %cst_8 : f32 to vector<2x2xf32>
    %10 = arith.maximumf %8, %9 : vector<2x2xf32>
    %c0_9 = arith.constant 0 : index
    %c0_10 = arith.constant 0 : index
    %11 = vector.load %arg4[%c0_9, %c0_10] : memref<2x4xf32, #tpu.memory_space<vmem>>, vector<2x4xf32>
    %cst_11 = arith.constant dense<0.000000e+00> : vector<2x4xf32>
    %12 = tpu.matmul %10, %11, %cst_11 {dimension_numbers = #tpu.dot_dimension_numbers<[1], [0], [0], [1], [0, 0, 1, 1], [], []>} : vector<2x2xf32>, vector<2x4xf32>, vector<2x4xf32> -> vector<2x4xf32>
    %c0_12 = arith.constant 0 : index
    %c0_13 = arith.constant 0 : index
    %13 = vector.load %arg5[%c0_12, %c0_13] : memref<1x4xf32, #tpu.memory_space<vmem>>, vector<1x4xf32>
    %14 = vector.broadcast %13 : vector<1x4xf32> to vector<2x4xf32>
    %15 = arith.addf %12, %14 : vector<2x4xf32>
    %16 = arith.negf %15 : vector<2x4xf32>
    %17 = math.exp %16 : vector<2x4xf32>
    %cst_14 = arith.constant 1.000000e+00 : f32
    %18 = vector.broadcast %cst_14 : f32 to vector<2x4xf32>
    %19 = arith.addf %18, %17 : vector<2x4xf32>
    %20 = arith.divf %18, %19 : vector<2x4xf32>
    %21 = vector.shape_cast %20 : vector<2x4xf32> to vector<2x4x1xf32>
    %22 = vector.broadcast %21 : vector<2x4x1xf32> to vector<2x4x16xf32>
    %23 = arith.mulf %0, %22 : vector<2x4x16xf32>
    %c0_15 = arith.constant 0 : index
    %c0_16 = arith.constant 0 : index
    %24 = vector.load %arg6[%c0_15, %c0_16] : memref<4x1xf32, #tpu.memory_space<vmem>>, vector<4x1xf32>
    %25 = vector.shape_cast %24 : vector<4x1xf32> to vector<1x4x1xf32>
    %26 = vector.broadcast %25 : vector<1x4x1xf32> to vector<2x4x16xf32>
    %27 = arith.mulf %0, %26 : vector<2x4x16xf32>
    %cst_17 = arith.constant dense<0.000000e+00> : vector<2x16xf32>
    %28 = vector.multi_reduction <add>, %27, %cst_17 [1] : vector<2x4x16xf32> to vector<2x16xf32>
    %29 = vector.shape_cast %28 : vector<2x16xf32> to vector<2x1x16xf32>
    %c0_18 = arith.constant 0 : index
    %30 = memref.load %arg7[%c0_18] : memref<1xf32, #tpu.memory_space<smem>>
    %31 = vector.broadcast %30 : f32 to vector<2x1x16xf32>
    %32 = arith.addf %29, %31 : vector<2x1x16xf32>
    %33 = arith.negf %32 : vector<2x1x16xf32>
    %34 = math.exp %33 : vector<2x1x16xf32>
    %cst_19 = arith.constant 1.000000e+00 : f32
    %35 = vector.broadcast %cst_19 : f32 to vector<2x1x16xf32>
    %36 = arith.addf %35, %34 : vector<2x1x16xf32>
    %37 = arith.divf %35, %36 : vector<2x1x16xf32>
    %38 = vector.broadcast %37 : vector<2x1x16xf32> to vector<2x4x16xf32>
    %39 = arith.mulf %0, %38 : vector<2x4x16xf32>
    %40 = arith.maximumf %23, %39 : vector<2x4x16xf32>
    %c0_20 = arith.constant 0 : index
    %c0_21 = arith.constant 0 : index
    %c0_22 = arith.constant 0 : index
    %41 = vector.load %arg8[%c0_20, %c0_21, %c0_22] : memref<2x4x16xf32, #tpu.memory_space<vmem>>, vector<2x4x16xf32>
    tpu.vector_store %arg8[%c0_20, %c0_21, %c0_22], %40 {strides = array<i32>} : memref<2x4x16xf32, #tpu.memory_space<vmem>>, vector<2x4x16xf32>,
    return
  }
  func.func @transform_0(%arg0: i32) -> (i32, i32, i32) {
    %c0_i32 = arith.constant 0 : i32
    %c0_i32_0 = arith.constant 0 : i32
    %c0_i32_1 = arith.constant 0 : i32
    return %arg0, %c0_i32, %c0_i32_0 : i32, i32, i32
  }
  func.func @transform_1(%arg0: i32) -> (i32, i32) {
    %c0_i32 = arith.constant 0 : i32
    %c0_i32_0 = arith.constant 0 : i32
    %c0_i32_1 = arith.constant 0 : i32
    return %c0_i32, %c0_i32_0 : i32, i32
  }
  func.func @transform_2(%arg0: i32) -> (i32, i32) {
    %c0_i32 = arith.constant 0 : i32
    %c0_i32_0 = arith.constant 0 : i32
    %c0_i32_1 = arith.constant 0 : i32
    return %c0_i32, %c0_i32_0 : i32, i32
  }
  func.func @transform_3(%arg0: i32) -> (i32, i32) {
    %c0_i32 = arith.constant 0 : i32
    %c0_i32_0 = arith.constant 0 : i32
    %c0_i32_1 = arith.constant 0 : i32
    return %c0_i32, %c0_i32_0 : i32, i32
  }
  func.func @transform_4(%arg0: i32) -> (i32, i32) {
    %c0_i32 = arith.constant 0 : i32
    %c0_i32_0 = arith.constant 0 : i32
    %c0_i32_1 = arith.constant 0 : i32
    return %c0_i32, %c0_i32_0 : i32, i32
  }
  func.func @transform_5(%arg0: i32) -> (i32, i32) {
    %c0_i32 = arith.constant 0 : i32
    %c0_i32_0 = arith.constant 0 : i32
    %c0_i32_1 = arith.constant 0 : i32
    return %c0_i32, %c0_i32_0 : i32, i32
  }
  func.func @transform_6(%arg0: i32) -> i32 {
    %c0_i32 = arith.constant 0 : i32
    %c0_i32_0 = arith.constant 0 : i32
    return %c0_i32 : i32
  }
  func.func @transform_7(%arg0: i32) -> (i32, i32, i32) {
    %c0_i32 = arith.constant 0 : i32
    %c0_i32_0 = arith.constant 0 : i32
    %c0_i32_1 = arith.constant 0 : i32
    return %arg0, %c0_i32, %c0_i32_0 : i32, i32, i32
  }
}

</mosaic_0001>

<bundles_post_ra>
// kernel: tpu_custom_call.1
= control target key start
LH: loop header
LB: loop body
LE: loop exit
PB: predicated region body
PF: predicated region fallthrough
CT: control target
= control target key end

     0   :  { %vm30_vm0 = vcmask 125952   ;;  %s464_s0 = inlined_call_operand.vmem [shape: f32[2,4,16], index: 0, kind: input, shape index: {}]   ;;  %s465_s1 = inlined_call_operand.vmem [shape: f32[4,2], index: 1, kind: input, shape index: {}]   ;;  %s466_s2 = inlined_call_operand.vmem [shape: f32[1,2], index: 2, kind: input, shape index: {}]   ;;  %s467_s3 = inlined_call_operand.vmem [shape: f32[2,4], index: 3, kind: input, shape index: {}]   ;;  %s468_s4 = inlined_call_operand.vmem [shape: f32[1,4], index: 4, kind: input, shape index: {}]   ;;  %s469_s5 = inlined_call_operand.vmem [shape: f32[4,1], index: 5, kind: input, shape index: {}]   ;;  %s470_s6 = inlined_call_operand.<no memory space> [shape: f32[1], index: 6, kind: input, shape index: {}]   ;;  %s471_s7 = inlined_call_operand.hbm [shape: f32[2,4,16], index: 7, kind: output, shape index: {}]  }
   0x1   :  { %v422_v0 = vld [vmem:[%s464_s0] sm:$0xf]  ;;  %v427_v1 = vld [vmem:[%s464_s0 + $0x4] sm:$0xf] }
   0x2   :  { %v31_v2 = vsel %vm30_vm0, %v422_v0, 0.0 }
   0x3   :  { %13 = vsyncpa [#allocation4], 0  ;;  %32 = vadd.xlane.f32.xlu0 %v31_v2  ;;  %v34_v3 = vsel %vm30_vm0, %v427_v1, 0.0  ;;  %v40_v4 = vld [vmem:[%s465_s1] sm:$0xf]  ;;  %vm65_vm1 = vcmask 1043456   ;;  %v50_v6 = vlaneseq  ;;  %v271_v53 = vstv %s470_s6 }
   0x4   :  { %v373_v5 = vmov 0.0   ;;  %vm374_vm2 = vmmov 0   ;;  %vm60_vm3 = vcmask 1041409   ;;  %vm62_vm4 = vcmask 31744   ;;  %v140_v17 = vld [vmem:[%s467_s3] sm:$0x3] }
   0x5   :  { %321 = vmatprep.subr.mxu0 %v373_v5  ;;  %323 = vmatprep.mubr.msk.f32.mxu0 %vm374_vm2, %v373_v5  ;;  %v51_v7 = vand.u32 127, %v50_v6  ;;  %v53_v8 = vshrl.u32 %v50_v6, 7  ;;  %vm152_vm5 = vcmask 1041408   ;;  %v248_v18 = vld [vmem:[%s469_s5] sm:$0xf]  ;;  %v375_v19 = vmov 0  }
   0x6   :  { %322 = vmatpush3.msk.msra.mxu0 %vm65_vm1, %v40_v4  ;;  %326 = vmatprep.subr.mxu1 %v373_v5  ;;  %v308_v20 = vld [vmem:[%s466_s2] ss:$0 sm:$0xff]  ;;  %vm148_vm6 = vcmask 15360   ;;  %s376_s5 = smov [#allocation3]  }
   0x7   :  { %35 = vadd.xlane.f32.xlu0 %v34_v3  ;;  %328 = vmatprep.mubr.msk.f32.mxu1 %vm374_vm2, %v373_v5  ;;  %v54_v10 = vsub.s32 %v51_v7, %v53_v8  ;;  %v311_v25 = vld [vmem:[%s468_s4] ss:$0 sm:$0xff]  ;;  %v241_v32 = vsub.s32 1, %v53_v8  ;;  %v234_v33 = vsub.s32 0, %v53_v8  ;;  %s297_s12 = sshll.u32 %s376_s5, 4  ;;  %s298_s12 = int_to_ptr.vmem [resolvable:$true] %s297_s12 }
   0x8   :  { %327 = vmatpush3.msk.msra.mxu1 %vm152_vm5, %v140_v17  ;;  %337 = vset.pattern.permute.xlu1 %v375_v19  ;;  %s351_s6 = scalar_lea.vmem %s298_s12, 128  ;;  %p356_p1 = scmp.lt.s32.totalorder %s298_s12, %s298_s12 }
   0x9   :  { %338 = vset.pattern.permute.xlu0 %v375_v19  ;;  %251 = vperm.xlu1 %337, %v248_v18   ;;  %p352_p0 = scmp.ne.s32.totalorder %s298_s12, %s351_s6  ;;  %p357_p2 = scmp.lt.s32.totalorder %s351_s6, %s351_s6 }
   0xb   :  { %p358_p3 = por %p357_p2, %p356_p1 }
   0xd   :  { %p359_p4 = pnand %p358_p3, %p352_p0 }
  0x84   :  { %v252_v37 = vpop.permute.xlu1 %251 }
  0x85   :  { %v254_v38 = vmul.f32 %v252_v37, %v422_v0  ;;  %v255_v39 = vmul.f32 %v252_v37, %v427_v1 }
  0x87   :  { %v256_v40 = vsel %vm30_vm0, %v254_v38, 0.0  ;;  %v263_v41 = vsel %vm30_vm0, %v255_v39, 0.0 }
  0x88   :  { %v257_v42 = vrot.slane %v256_v40, 4  ;;  %v264_v43 = vrot.slane %v263_v41, 4 }
  0x8a   :  { %v258_v44 = vadd.f32 %v257_v42, %v256_v40  ;;  %v265_v45 = vadd.f32 %v264_v43, %v263_v41 }
  0x8c   :  { %v33_v9 = vpop.xlane.xlu0 %32  ;;  %v259_v46 = vrot.slane %v258_v44, 2  ;;  %v266_v47 = vrot.slane %v265_v45, 2 }
  0x8d   :  { %v38_v11 = vmul.f32 0.0625, %v33_v9 }
  0x8e   :  { %v260_v48 = vadd.f32 %v259_v46, %v258_v44  ;;  %v267_v49 = vadd.f32 %v266_v47, %v265_v45 }
  0x8f   :  { %v55_v14 = vrot.slane %v38_v11, %v54_v10 }
  0x90   :  { %v36_v12 = vpop.xlane.xlu0 %35  ;;  %v261_v50 = vrot.slane %v260_v48, 1  ;;  %v268_v51 = vrot.slane %v267_v49, 1 }
  0x91   :  { %v39_v13 = vmul.f32 0.0625, %v36_v12 }
  0x92   :  { %v262_v52 = vadd.f32 %v261_v50, %v260_v48  ;;  %v269_v54 = vadd.f32 %v268_v51, %v267_v49 }
  0x93   :  { %v59_v15 = vrot.slane %v39_v13, %v54_v10 }
  0x94   :  { %v272_v55 = vadd.f32 %v271_v53, %v262_v52  ;;  %v273_v56 = vadd.f32 %v271_v53, %v269_v54 }
  0x95   :  { %v61_v16 = vsel %vm60_vm3, %v59_v15, %v55_v14 }
  0x96   :  { %324 = vmatmul.mubr.msk.f32.vlgmr.msra.gmra.mxu0 %vm62_vm4, %v61_v16  ;;  %v315_v57 = vmul.f32 -1.442695, %v272_v55  ;;  %v316_v58 = vmul.f32 -1.442695, %v273_v56 }
 0x156   :  { %v135_v21 = vpop.f32.mrf.mxu0 }
 0x157   :  { %v136_v22 = vadd.f32 %v308_v20, %v135_v21 }
 0x158   :  { %v325_v23 = vpop.f32.mrf.mxu0 }
 0x159   :  { %v139_v24 = vmax.f32 %v136_v22, 0.0 }
 0x15b   :  { %329 = vmatmul.mubr.msk.f32.vlgmr.msra.gmra.mxu1 %vm148_vm6, %v139_v24 }
 0x21b   :  { %v222_v26 = vpop.f32.mrf.mxu1 }
 0x21c   :  { %v223_v27 = vadd.f32 %v311_v25, %v222_v26 }
 0x21d   :  { %v330_v28 = vpop.f32.mrf.mxu1 }
 0x21e   :  { %v314_v29 = vmul.f32 -1.442695, %v223_v27 }
 0x220   :  { %339 = vpow2.f32 %v314_v29 }
 0x22d   :  { %v340_v30 = vpop.eup %339 }
 0x22e   :  { %v229_v31 = vadd.f32 1.0, %v340_v30 }
 0x230   :  { %341 = vrcp.f32 %v229_v31 }
 0x231   :  { %343 = vpow2.f32 %v315_v57 }
 0x232   :  { %345 = vpow2.f32 %v316_v58 }
 0x23d   :  { %v342_v34 = vpop.eup %341 }
 0x23e   :  { %v242_v35 = vrot.slane %v342_v34, %v241_v32  ;;  %v235_v36 = vrot.slane %v342_v34, %v234_v33  ;;  %v344_v59 = vpop.eup %343 }
 0x23f   :  { %v346_v60 = vpop.eup %345  ;;  %v280_v61 = vadd.f32 1.0, %v344_v59 }
 0x240   :  { %244 = vbcast.lane.b32.xlu0 %v242_v35, 256  ;;  %237 = vbcast.lane.b32.xlu1 %v235_v36, 256  ;;  %v281_v62 = vadd.f32 1.0, %v346_v60 }
 0x241   :  { %347 = vrcp.f32 %v280_v61 }
 0x242   :  { %349 = vrcp.f32 %v281_v62 }
 0x24e   :  { %v348_v63 = vpop.eup %347 }
 0x24f   :  { %v350_v2 = vpop.eup %349  ;;  %v286_v7 = vmul.f32 %v348_v63, %v422_v0 }
 0x250   :  { %v287_v5 = vmul.f32 %v350_v2, %v427_v1 }
 0x2b2   :  { %v245_v3 = vpop.permute.xlu0 %244  ;;  %v238_v4 = vpop.permute.xlu1 %237 }
 0x2b3   :  { %v247_v6 = vmul.f32 %v245_v3, %v427_v1  ;;  %v246_v8 = vmul.f32 %v238_v4, %v422_v0 }
 0x2b5   :  { %v289_v9 = vmax.f32 %v247_v6, %v287_v5  ;;  %v288_v10 = vmax.f32 %v246_v8, %v286_v7 }
 0x2b7   :  { %291 = vst.msk [vmem:[#allocation3 + $0x4] sm:$0xf] %vm30_vm0, %v289_v9  ;;  %290 = vst.msk [vmem:[#allocation3] sm:$0xf] %vm30_vm0, %v288_v10 }
 0x2b8   :  { %362 = shalt.err (!%p359_p4)
}
 0x2b9   :  { %s377_s13 = smov 64   ;;  %s378_s14 = smov 4  }
 0x2ba   :  { %303 = dma.vmem_to_hbm [thread:$0]  %s298_s12, 128, %s471_s7, [#allocation4], %s377_s13, %s377_s13, %s378_s14  }
 0x2bb   :  { %371 = dma.done.wait [#allocation4], 128  }
 0x2bc   :  { %372 = vsyncadd [#allocation4], 4294967168 }
 0x2bd   :  { %307 = vsyncpa [#allocation4], 1 }

</bundles_post_ra>
